<compile_context>
chip_gen: v7x
topology: tpu7x:2x2x1
jax: 0.10.0
libtpu: 0.0.40
codegen_flags: <defaults>
</compile_context>

<pallas_src>
import functools

import jax
import jax.numpy as jnp
from jax.experimental import pallas as pl
from jax.experimental.pallas import tpu as pltpu


def _identity_dma_kernel(x_ref, o_ref, sems, *, row_splits):
    """Direct HBM->HBM copy: no VMEM staging, no vld/vst round-trip.

    `row_splits` is a static tuple of (start, size) row chunks.  All chunk
    DMAs are started first (kept in flight together), then waited on.
    """
    copies = [
        pltpu.make_async_copy(
            x_ref.at[pl.ds(start, size)],
            o_ref.at[pl.ds(start, size)],
            sems.at[i],
        )
        for i, (start, size) in enumerate(row_splits)
    ]
    for cp in copies:
        cp.start()
    for cp in copies:
        cp.wait()


_MAX_COLS = 8192          # cap on the lane-dense row width
_MAX_CHUNKS = 4           # max concurrent DMA chunks
_CHUNK_BYTES_MIN = 512 * 1024   # below this, a single DMA is cheapest


def _choose_cols(n: int):
    """Largest multiple-of-128 divisor of n (<= _MAX_COLS), preferring one
    that still leaves >= _MAX_CHUNKS rows so the copy can be chunked."""
    hi = min(_MAX_COLS, n)
    hi -= hi % 128
    best = None
    for c in range(hi, 0, -128):
        if n % c == 0:
            if best is None:
                best = c
            if n // c >= _MAX_CHUNKS:
                return c
    return best


def _copy_hbm2hbm(x2: jax.Array) -> jax.Array:
    rows, cols = x2.shape
    total_bytes = rows * cols * x2.dtype.itemsize

    if total_bytes < _CHUNK_BYTES_MIN:
        num_chunks = 1
    else:
        num_chunks = max(1, min(_MAX_CHUNKS, rows))

    base, rem = divmod(rows, num_chunks)
    row_splits = []
    start = 0
    for i in range(num_chunks):
        size = base + (1 if i < rem else 0)
        row_splits.append((start, size))
        start += size
    row_splits = tuple(row_splits)

    return pl.pallas_call(
        functools.partial(_identity_dma_kernel, row_splits=row_splits),
        out_shape=jax.ShapeDtypeStruct((rows, cols), x2.dtype),
        in_specs=[pl.BlockSpec(memory_space=pl.ANY)],   # raw HBM ref, no auto-DMA
        out_specs=pl.BlockSpec(memory_space=pl.ANY),    # raw HBM ref, written via DMA
        scratch_shapes=[pltpu.SemaphoreType.DMA((num_chunks,))],
    )(x2)


@jax.jit
def identity(x: jax.Array) -> jax.Array:
    """Identity forward pass as a Pallas TPU kernel (any rank, any dtype).

    NOTE: callers that donate `x` should just `return x` (zero HBM traffic);
    this function performs one explicit HBM->HBM DMA copy, the minimum cost
    of materializing a fresh output buffer.
    """
    orig_shape = x.shape
    n = x.size
    if n == 0:
        return x

    cols = _choose_cols(n)
    if cols is not None:
        x2 = x.reshape(n // cols, cols)       # lane-dense, long contiguous rows
    elif x.ndim >= 2:
        x2 = x.reshape(-1, orig_shape[-1])    # n % 128 != 0: keep last dim
    else:
        x2 = x.reshape(1, n)                  # scalars / odd 1-D

    return _copy_hbm2hbm(x2).reshape(orig_shape)


if __name__ == "__main__":
    key = jax.random.PRNGKey(0)
    # NCHW: batch=2, channels=4, spatial=16x16 (small, deterministic)
    x = jax.random.normal(key, (2, 4, 16, 16), dtype=jnp.float32)

    y = identity(x)
    jax.block_until_ready(y)

    assert y.shape == x.shape and y.dtype == x.dtype
    assert bool(jnp.all(y == x))
    print("KERNEL_OK")
</pallas_src>

<mosaic_0001>
module attributes {stable_mosaic.version = 11 : i64} {
  func.func @_identity_dma_kernel(%arg0: memref<4x512xf32, #tpu.memory_space<any>>, %arg1: memref<4x512xf32, #tpu.memory_space<any>>, %arg2: memref<1x!tpu.dma_semaphore, #tpu.memory_space<semaphore_mem>>) attributes {dimension_semantics = [], scalar_prefetch = 0 : i64, scratch_operands = 1 : i64, tpu.core_type = #tpu.core_type<tc>} {
    %c0_i32 = arith.constant 0 : i32
    %c0_i32_0 = arith.constant 0 : i32
    %c0_i32_1 = arith.constant 0 : i32
    %0 = tpu.memref_slice %arg0[%c0_i32_0, %c0_i32_1] : memref<4x512xf32, #tpu.memory_space<any>> -> memref<4x512xf32, #tpu.memory_space<any>>
    %c0_i32_2 = arith.constant 0 : i32
    %c0_i32_3 = arith.constant 0 : i32
    %1 = tpu.memref_slice %arg1[%c0_i32_2, %c0_i32_3] : memref<4x512xf32, #tpu.memory_space<any>> -> memref<4x512xf32, #tpu.memory_space<any>>
    %2 = tpu.memref_slice %arg2[%c0_i32] : memref<1x!tpu.dma_semaphore, #tpu.memory_space<semaphore_mem>> -> memref<1x!tpu.dma_semaphore, #tpu.memory_space<semaphore_mem>>
    %3 = tpu.memref_squeeze %2 : memref<1x!tpu.dma_semaphore, #tpu.memory_space<semaphore_mem>> -> memref<!tpu.dma_semaphore, #tpu.memory_space<semaphore_mem>>
    tpu.enqueue_dma source(%0 : memref<4x512xf32, #tpu.memory_space<any>>) target(%1 : memref<4x512xf32, #tpu.memory_space<any>>) target_semaphore(%3 : memref<!tpu.dma_semaphore, #tpu.memory_space<semaphore_mem>>)
    %c0_i32_4 = arith.constant 0 : i32
    %c0_i32_5 = arith.constant 0 : i32
    %c0_i32_6 = arith.constant 0 : i32
    %4 = tpu.memref_slice %arg0[%c0_i32_5, %c0_i32_6] : memref<4x512xf32, #tpu.memory_space<any>> -> memref<4x512xf32, #tpu.memory_space<any>>
    %c0_i32_7 = arith.constant 0 : i32
    %c0_i32_8 = arith.constant 0 : i32
    %5 = tpu.memref_slice %arg1[%c0_i32_7, %c0_i32_8] : memref<4x512xf32, #tpu.memory_space<any>> -> memref<4x512xf32, #tpu.memory_space<any>>
    %6 = tpu.memref_slice %arg2[%c0_i32_4] : memref<1x!tpu.dma_semaphore, #tpu.memory_space<semaphore_mem>> -> memref<1x!tpu.dma_semaphore, #tpu.memory_space<semaphore_mem>>
    %7 = tpu.memref_squeeze %6 : memref<1x!tpu.dma_semaphore, #tpu.memory_space<semaphore_mem>> -> memref<!tpu.dma_semaphore, #tpu.memory_space<semaphore_mem>>
    tpu.wait_dma2 semaphore(%7 : memref<!tpu.dma_semaphore, #tpu.memory_space<semaphore_mem>>) src(%4 : memref<4x512xf32, #tpu.memory_space<any>>) dst(%5 : memref<4x512xf32, #tpu.memory_space<any>>)
    return
  }
}

</mosaic_0001>

<bundles_post_ra>
// kernel: identity.1
= control target key start
LH: loop header
LB: loop body
LE: loop exit
PB: predicated region body
PF: predicated region fallthrough
CT: control target
= control target key end

     0   :  { %s93_s0 = inlined_call_operand.vmem [shape: f32[4,512], index: 0, kind: input, shape index: {}]   ;;  %s94_s1 = inlined_call_operand.vmem [shape: f32[4,512], index: 1, kind: output, shape index: {}]  }
   0x1   :  { %v38_v0 = vld [vmem:[%s93_s0] sm:$0xff]  ;;  %v40_v1 = vld [vmem:[%s93_s0 + $0x8] sm:$0xff] }
   0x2   :  { %39 = vst [vmem:[%s94_s1] sm:$0xff] %v38_v0  ;;  %41 = vst [vmem:[%s94_s1 + $0x8] sm:$0xff] %v40_v1 }
   0x3   :  { %49 = vsyncadd [#allocation2], 256 }
   0x4   :  { %69 = dma.done.wait [#allocation2], 256 }
   0x5   :  { %70 = vsyncadd [#allocation2], 4294967040 }
   0x6   :  { %54 = vsyncmov [#allocation2] }
   0x9   :  { %s55_s14 = vpop.sfrf %54 }
   0xa   :  { %p68_p0 = scmp.ne.s32.totalorder %s55_s14, 0 }
   0xc   :  { %59 = shalt.err (%p68_p0)  }

</bundles_post_ra>
